<compile_context>
chip_gen: v7x
topology: tpu7x:2x2x1
jax: 0.10.0
libtpu: 0.0.40
codegen_flags: <defaults>
</compile_context>

<pallas_src>
import math

import jax
import jax.numpy as jnp
from jax.experimental import pallas as pl
from jax.experimental.pallas import tpu as pltpu


def _identity_kernel(x_ref, o_ref):
    # Whole-tile load + store; there is no compute in Identity.
    o_ref[...] = x_ref[...]


_SMALL_BYTES = 2 * 1024 * 1024          # single-block (no grid) threshold
_TARGET_TILE_BYTES = 8 * 1024 * 1024    # ~8 MiB tiles; 4 buffers = 32 MiB
_VMEM_LIMIT_BYTES = 48 << 20            # < 64 MiB (v7x) with headroom
_MAX_LANES = 4096                       # cap on the lane-dense column width


def identity(x):
    """Identity forward pass (matches nn.Identity): return x unchanged.

    Zero-cost: no kernel launch, no HBM traffic.  If the caller needs a
    physically distinct buffer, use `identity_copy` below.
    """
    return x


def _lane_dense_cols(n):
    """Largest multiple of 128 that divides n, capped at _MAX_LANES.

    Returns None if n is not divisible by 128 (handled by slab+tail split).
    """
    if n % 128 != 0:
        return None
    m = n // 128
    for f in range(min(_MAX_LANES // 128, m), 0, -1):
        if m % f == 0:
            return 128 * f
    return 128


def identity_copy(x):
    """Materialize a fresh copy of x via a Pallas TPU kernel."""
    orig_shape = x.shape
    dtype = x.dtype
    n = math.prod(orig_shape) if orig_shape else 1
    if n == 0:
        return x  # nothing to copy

    itemsize = jnp.dtype(dtype).itemsize
    total_bytes = n * itemsize

    # --- Small inputs: one full-array block, no grid, no masking. ----------
    if total_bytes <= _SMALL_BYTES:
        cols = _lane_dense_cols(n) or n
        x2 = x.reshape(n // cols, cols)
        out = pl.pallas_call(
            _identity_kernel,
            out_shape=jax.ShapeDtypeStruct(x2.shape, dtype),
        )(x2)
        return out.reshape(orig_shape)

    # --- Large, not 128-divisible (rare): lane-dense slab + tiny tail. -----
    if n % 128 != 0:
        x_flat = x.reshape(n)
        n_main = (n // 128) * 128
        main = identity_copy(x_flat[:n_main])   # grid path, lane-dense
        tail = identity_copy(x_flat[n_main:])   # < 128 elems -> small path
        return jnp.concatenate([main, tail]).reshape(orig_shape)

    # --- Large inputs: 1-D grid of ~8 MiB lane-dense row tiles. ------------
    cols = _lane_dense_cols(n)
    rows = n // cols
    x2 = x.reshape(rows, cols)

    # Sublane granularity matches dtype packing (f32: 8, bf16: 16, i8: 32).
    sub = 8 * max(1, 4 // itemsize)
    tr = _TARGET_TILE_BYTES // (cols * itemsize)
    tr = max(sub, (tr // sub) * sub)
    if tr >= rows:
        tr = rows  # block spans the full row dim -> always legal

    grid = (pl.cdiv(rows, tr),)

    out = pl.pallas_call(
        _identity_kernel,
        out_shape=jax.ShapeDtypeStruct((rows, cols), dtype),
        grid_spec=pltpu.PrefetchScalarGridSpec(
            num_scalar_prefetch=0,
            grid=grid,
            in_specs=[pl.BlockSpec((tr, cols), lambda i: (i, 0))],
            out_specs=pl.BlockSpec((tr, cols), lambda i: (i, 0)),
        ),
        compiler_params=pltpu.CompilerParams(
            dimension_semantics=("parallel",),
            vmem_limit_bytes=_VMEM_LIMIT_BYTES,
        ),
    )(x2)
    return out.reshape(orig_shape)


if __name__ == "__main__":
    key = jax.random.PRNGKey(0)

    # NCHW input matching the module's usage: batch=2, channels=4, 16x16.
    x = jax.random.normal(key, (2, 4, 16, 16), dtype=jnp.float32)

    # Zero-cost Identity path (exact nn.Identity semantics).
    y = identity(x)
    assert y is x

    # Pallas copy path, small/no-grid block.
    yc = jax.block_until_ready(identity_copy(x))
    assert yc.shape == x.shape, (yc.shape, x.shape)
    assert yc.dtype == x.dtype, (yc.dtype, x.dtype)
    assert bool(jnp.all(yc == x)), "Identity copy mismatch (small path)"

    # Pallas copy path, tiled 1-D grid (exercises multi-step pipeline).
    xl = jax.random.normal(jax.random.PRNGKey(1), (2048, 2048), jnp.float32)
    yl = jax.block_until_ready(identity_copy(xl))
    assert yl.shape == xl.shape and yl.dtype == xl.dtype
    assert bool(jnp.all(yl == xl)), "Identity copy mismatch (tiled path)"

    print("KERNEL_OK")
</pallas_src>

<mosaic_0001>
module attributes {stable_mosaic.version = 11 : i64} {
  func.func @_identity_kernel(%arg0: memref<1x2048xf32, #tpu.memory_space<vmem>>, %arg1: memref<1x2048xf32, #tpu.memory_space<vmem>>) attributes {dimension_semantics = [], scalar_prefetch = 0 : i64, scratch_operands = 0 : i64, tpu.core_type = #tpu.core_type<tc>} {
    %c0 = arith.constant 0 : index
    %c0_0 = arith.constant 0 : index
    %0 = vector.load %arg0[%c0, %c0_0] : memref<1x2048xf32, #tpu.memory_space<vmem>>, vector<1x2048xf32>
    %c0_1 = arith.constant 0 : index
    %c0_2 = arith.constant 0 : index
    %1 = vector.load %arg1[%c0_1, %c0_2] : memref<1x2048xf32, #tpu.memory_space<vmem>>, vector<1x2048xf32>
    tpu.vector_store %arg1[%c0_1, %c0_2], %0 {strides = array<i32>} : memref<1x2048xf32, #tpu.memory_space<vmem>>, vector<1x2048xf32>,
    return
  }
}

</mosaic_0001>

<bundles_post_ra>
// kernel: tpu_custom_call.1
= control target key start
LH: loop header
LB: loop body
LE: loop exit
PB: predicated region body
PF: predicated region fallthrough
CT: control target
= control target key end

     0   :  { %6 = vsyncpa [#allocation3], 0  ;;  %s126_s0 = inlined_call_operand.hbm [shape: f32[1,2048], index: 0, kind: input, shape index: {}]   ;;  %s127_s1 = inlined_call_operand.hbm [shape: f32[1,2048], index: 1, kind: output, shape index: {}]  }
   0x1   :  { %7 = vsyncpa [#allocation4], 0  ;;  %s90_s6 = smov [#allocation2]   ;;  %s42_s10 = scalar_lea.hbm %s126_s0, 256 }
   0x2   :  { %s14_s7 = sshll.u32 %s90_s6, 4  ;;  %p43_p0 = scmp.ne.s32.totalorder %s126_s0, %s42_s10  ;;  %s15_s7 = int_to_ptr.vmem [resolvable:$true] %s14_s7 }
   0x3   :  { %p46_p1 = scmp.lt.u32.totalorder %s42_s10, %s126_s0 }
   0x5   :  { %p48_p2 = pnand %p46_p1, %p43_p0 }
   0x7   :  { %51 = shalt.err (!%p48_p2)
}
   0x8   :  { %s52_s15 = scalar_lea.vmem %s15_s7, 256  ;;  %p57_p4 = scmp.lt.s32.totalorder %s15_s7, %s15_s7 }
   0x9   :  { %p53_p3 = scmp.ne.s32.totalorder %s15_s7, %s52_s15  ;;  %p58_p5 = scmp.lt.s32.totalorder %s52_s15, %s52_s15 }
   0xb   :  { %p59_p6 = por %p58_p5, %p57_p4 }
   0xd   :  { %p60_p7 = pnand %p59_p6, %p53_p3 }
   0xf   :  { %63 = shalt.err (!%p60_p7)
}
  0x10   :  { %17 = dma.hbm_to_vmem [thread:$0]  %s126_s0, 256, %s15_s7, [#allocation3]  }
  0x11   :  { %86 = dma.done.wait [#allocation3], 256  }
  0x12   :  { %87 = vsyncadd [#allocation3], 4294967040  ;;  %s91_s18 = smov [#allocation5]   ;;  %v21_v0 = vld [vmem:[#allocation2] sm:$0xff]  ;;  %v22_v1 = vld [vmem:[#allocation2 + $0x8] sm:$0xff] }
  0x13   :  { %s31_s19 = sshll.u32 %s91_s18, 4  ;;  %23 = vst [vmem:[#allocation5] sm:$0xff] %v21_v0  ;;  %24 = vst [vmem:[#allocation5 + $0x8] sm:$0xff] %v22_v1  ;;  %s32_s19 = int_to_ptr.vmem [resolvable:$true] %s31_s19 }
  0x14   :  { %s64_s20 = scalar_lea.vmem %s32_s19, 256  ;;  %p69_p9 = scmp.lt.s32.totalorder %s32_s19, %s32_s19 }
  0x15   :  { %p65_p8 = scmp.ne.s32.totalorder %s32_s19, %s64_s20  ;;  %p70_p10 = scmp.lt.s32.totalorder %s64_s20, %s64_s20 }
  0x17   :  { %p71_p11 = por %p70_p10, %p69_p9 }
  0x19   :  { %p72_p12 = pnand %p71_p11, %p65_p8 }
  0x1b   :  { %75 = shalt.err (!%p72_p12)
}
  0x1c   :  { %s76_s0 = scalar_lea.hbm %s127_s1, 256 }
  0x1d   :  { %p77_p13 = scmp.ne.s32.totalorder %s127_s1, %s76_s0  ;;  %p80_p0 = scmp.lt.u32.totalorder %s76_s0, %s127_s1 }
  0x1f   :  { %p82_p1 = pnand %p80_p0, %p77_p13 }
  0x21   :  { %85 = shalt.err (!%p82_p1)
}
  0x22   :  { %34 = dma.vmem_to_hbm [thread:$0]  %s32_s19, 256, %s127_s1, [#allocation4]  }
  0x23   :  { %88 = dma.done.wait [#allocation4], 256  }
  0x24   :  { %89 = vsyncadd [#allocation4], 4294967040 }
  0x25   :  { %38 = vsyncpa [#allocation3], 1 }
  0x26   :  { %39 = vsyncpa [#allocation4], 1 }

</bundles_post_ra>
